<compile_context>
chip_gen: v7x
topology: tpu7x:2x2x1
jax: 0.10.0
libtpu: 0.0.40
codegen_flags: <defaults>
</compile_context>

<pallas_src>
import functools

import jax
import jax.numpy as jnp
from jax.experimental import pallas as pl
from jax.experimental.pallas import tpu as pltpu

_LANE = 128      # lane width: pad feature dims to this
_SUBLANE = 8     # sublane width: batch tiles are multiples of this


def _round_up(n, m):
    return ((n + m - 1) // m) * m


# ----------------------------- fused Pallas kernel ----------------------------- #

def _make_fused_encoder_kernel(num_hidden):
    """Kernel refs layout (per batch tile):
       [alphas(SMEM prefetch), x_tile, (W'_0, shift'_0), ..., (W'_{H-1}, shift'_{H-1}),
        W_final, b_final, out_tile]"""

    def kernel(*refs):
        alphas_ref = refs[0]          # SMEM, (num_hidden,) PReLU slopes
        x_ref = refs[1]               # (B_TILE, D_pad) f32
        idx = 2
        h = x_ref[...]                # activations stay in vregs/VMEM for all layers
        for i in range(num_hidden):   # unrolled at trace time
            w_ref = refs[idx]         # bf16 folded weight
            s_ref = refs[idx + 1]     # f32 folded (bias + BN eval) shift
            idx += 2
            y = jnp.dot(h.astype(jnp.bfloat16), w_ref[...],
                        preferred_element_type=jnp.float32)
            y = y + s_ref[...]
            a = alphas_ref[i]         # PReLU single learnable slope (num_parameters=1)
            h = jnp.where(y >= 0.0, y, a * y)

        wf_ref = refs[idx]
        bf_ref = refs[idx + 1]
        o_ref = refs[idx + 2]
        y = jnp.dot(h.astype(jnp.bfloat16), wf_ref[...],
                    preferred_element_type=jnp.float32) + bf_ref[...]
        # F.normalize(dim=1, eps=1e-12): y / max(||y||, eps) == y * rsqrt(max(ss, eps^2))
        ss = jnp.sum(y * y, axis=1, keepdims=True)
        eps = 1e-12
        o_ref[...] = y * jax.lax.rsqrt(jnp.maximum(ss, eps * eps))

    return kernel


# ----------------------- host-side fold + pad of parameters -------------------- #

def fold_and_pad_params(params, bn_eps=1e-5):
    """Fold BatchNorm1d (eval) + Linear bias into weights; zero-pad to lane multiples.
    Weights are stored in bf16 (MXU-native), shifts/slopes stay f32."""
    hidden_w, hidden_shift, alphas = [], [], []
    for layer in params["hidden"]:
        scale = layer["gamma"] / jnp.sqrt(layer["var"] + bn_eps)      # (1, out)
        shift = layer["beta"] - layer["mean"] * scale                 # (1, out)
        w_f = layer["w"] * scale                                      # (in, out)
        s_f = layer["b"] * scale + shift                              # (1, out)
        in_p = _round_up(w_f.shape[0], _LANE)
        out_p = _round_up(w_f.shape[1], _LANE)
        hidden_w.append(jnp.pad(w_f, ((0, in_p - w_f.shape[0]),
                                      (0, out_p - w_f.shape[1]))).astype(jnp.bfloat16))
        hidden_shift.append(jnp.pad(s_f, ((0, 0),
                                          (0, out_p - s_f.shape[1]))).astype(jnp.float32))
        alphas.append(jnp.asarray(layer["alpha"], jnp.float32))

    wf, bf = params["final"]["w"], params["final"]["b"]
    in_p = _round_up(wf.shape[0], _LANE)
    out_p = _round_up(wf.shape[1], _LANE)
    final_w = jnp.pad(wf, ((0, in_p - wf.shape[0]),
                           (0, out_p - wf.shape[1]))).astype(jnp.bfloat16)
    final_b = jnp.pad(bf, ((0, 0), (0, out_p - bf.shape[1]))).astype(jnp.float32)

    return {
        "alphas": jnp.stack(alphas),           # (num_hidden,) f32
        "hidden_w": hidden_w,                  # list of (in_pad, out_pad) bf16
        "hidden_shift": hidden_shift,          # list of (1, out_pad) f32
        "final_w": final_w,                    # (in_pad, latent_pad) bf16
        "final_b": final_b,                    # (1, latent_pad) f32
    }


# --------------------------------- forward pass -------------------------------- #

@functools.partial(jax.jit, static_argnames=("latent_dim", "b_tile"))
def mlp_encoder_forward(x, folded, latent_dim, b_tile=256):
    B, D = x.shape
    # batch tile: multiple of the 8-row sublane, no bigger than the (padded) batch
    bt = _round_up(min(b_tile, _round_up(B, _SUBLANE)), _SUBLANE)
    B_pad = _round_up(B, bt)
    D_pad = folded["hidden_w"][0].shape[0]
    latent_pad = folded["final_w"].shape[1]
    num_hidden = len(folded["hidden_w"])

    x_pad = x.astype(jnp.float32)
    if B_pad != B or D_pad != D:
        x_pad = jnp.pad(x_pad, ((0, B_pad - B), (0, D_pad - D)))

    operands = [folded["alphas"], x_pad]
    weight_operands = []
    for w, s in zip(folded["hidden_w"], folded["hidden_shift"]):
        weight_operands += [w, s]
    weight_operands += [folded["final_w"], folded["final_b"]]
    operands += weight_operands

    grid = (B_pad // bt,)

    # x / out are tiled over the batch grid; all weights/shifts stay VMEM-resident.
    in_specs = [pl.BlockSpec((bt, D_pad), lambda i, alphas: (i, 0))]
    for op in weight_operands:
        in_specs.append(pl.BlockSpec(op.shape, lambda i, alphas: (0, 0)))
    out_spec = pl.BlockSpec((bt, latent_pad), lambda i, alphas: (i, 0))

    # explicit VMEM budget: resident weights + double-buffered activation tiles + slack
    weight_bytes = sum(int(op.size) * op.dtype.itemsize for op in weight_operands)
    io_bytes = 2 * (bt * D_pad + bt * latent_pad) * 4          # double-buffered x/out
    widest = max([w.shape[1] for w in folded["hidden_w"]] + [D_pad, latent_pad])
    act_bytes = 3 * bt * widest * 4                             # in-kernel activations
    vmem_needed = weight_bytes + io_bytes + act_bytes + (2 << 20)
    vmem_limit = int(min(max(vmem_needed, 4 << 20), 64 << 20))  # clamp for v7x 64 MiB

    # advisory cost estimate for the XLA scheduler
    flops = 0
    for w in folded["hidden_w"] + [folded["final_w"]]:
        flops += 2 * B_pad * w.shape[0] * w.shape[1]
    bytes_accessed = (x_pad.size + B_pad * latent_pad) * 4 + weight_bytes

    out_pad = pl.pallas_call(
        _make_fused_encoder_kernel(num_hidden),
        out_shape=jax.ShapeDtypeStruct((B_pad, latent_pad), jnp.float32),
        grid_spec=pltpu.PrefetchScalarGridSpec(
            num_scalar_prefetch=1,            # alphas -> SMEM before the grid runs
            grid=grid,
            in_specs=in_specs,
            out_specs=out_spec,
        ),
        compiler_params=pltpu.CompilerParams(
            dimension_semantics=("parallel",),    # megacore sharding on v7x
            vmem_limit_bytes=vmem_limit,
        ),
        cost_estimate=pl.CostEstimate(flops=flops, transcendentals=B_pad,
                                      bytes_accessed=bytes_accessed),
    )(*operands)

    return out_pad[:B, :latent_dim]


# ------------------------------ parameter creation ------------------------------ #

def init_params(key, input_dim, hidden_dims, latent_dim):
    """Raw (PyTorch-equivalent, eval-mode) parameters; W stored as (in, out)."""
    params = {"hidden": [], "final": {}}
    dims = [input_dim] + list(hidden_dims)
    for i in range(len(hidden_dims)):
        key, k_w, k_b, k_g, k_be, k_m, k_v = jax.random.split(key, 7)
        fan_in, fan_out = dims[i], dims[i + 1]
        w = jax.random.normal(k_w, (fan_in, fan_out), jnp.float32) * 0.05
        b = jax.random.normal(k_b, (1, fan_out), jnp.float32) * 0.05
        gamma = 1.0 + 0.1 * jax.random.normal(k_g, (1, fan_out), jnp.float32)
        beta = 0.1 * jax.random.normal(k_be, (1, fan_out), jnp.float32)
        mean = 0.1 * jax.random.normal(k_m, (1, fan_out), jnp.float32)
        var = jnp.abs(1.0 + 0.1 * jax.random.normal(k_v, (1, fan_out), jnp.float32))
        alpha = jnp.float32(0.25)     # nn.PReLU() default: single slope, 0.25
        params["hidden"].append(dict(w=w, b=b, gamma=gamma, beta=beta,
                                     mean=mean, var=var, alpha=alpha))
    key, k_w, k_b = jax.random.split(key, 3)
    w = jax.random.normal(k_w, (hidden_dims[-1], latent_dim), jnp.float32) * 0.05
    b = jax.random.normal(k_b, (1, latent_dim), jnp.float32) * 0.05
    params["final"] = dict(w=w, b=b)
    return params


# pure-JAX f32 reference (unfolded math, mirrors the PyTorch module in eval mode)
def reference_forward(x, params, bn_eps=1e-5):
    h = x
    for layer in params["hidden"]:
        z = h @ layer["w"] + layer["b"]
        z = (layer["gamma"] * (z - layer["mean"])
             / jnp.sqrt(layer["var"] + bn_eps) + layer["beta"])
        h = jnp.where(z >= 0.0, z, layer["alpha"] * z)
    y = h @ params["final"]["w"] + params["final"]["b"]
    nrm = jnp.sqrt(jnp.sum(y * y, axis=1, keepdims=True))
    return y / jnp.maximum(nrm, 1e-12)


# ------------------------------------- main ------------------------------------- #

if __name__ == "__main__":
    batch = 32
    input_dim = 32
    hidden_dims = [64, 48]
    latent_dim = 16

    key = jax.random.PRNGKey(0)
    k_x, k_p = jax.random.split(key)
    x = jax.random.normal(k_x, (batch, input_dim), jnp.float32)
    params = init_params(k_p, input_dim, hidden_dims, latent_dim)

    folded = fold_and_pad_params(params)
    # small batch tile so the demo exercises a multi-step pipelined grid (grid = 4)
    out = mlp_encoder_forward(x, folded, latent_dim, b_tile=8)
    out = jax.block_until_ready(out)

    ref = reference_forward(x, params)
    assert out.shape == (batch, latent_dim)
    # bf16 weights with f32 accumulation vs f32 reference: loosened tolerance
    assert jnp.allclose(out, ref, atol=3e-2), "mismatch vs reference"
    # rows should be unit L2-norm (normalization is done in f32 inside the kernel)
    assert jnp.allclose(jnp.linalg.norm(out, axis=1), 1.0, atol=1e-4)

    print("KERNEL_OK")
</pallas_src>

<mosaic_0001>
module attributes {stable_mosaic.version = 11 : i64} {
  func.func @kernel(%arg0: i32, %arg1: memref<2xf32, #tpu.memory_space<smem>>, %arg2: memref<8x128xf32, #tpu.memory_space<vmem>>, %arg3: memref<128x128xbf16, #tpu.memory_space<vmem>>, %arg4: memref<1x128xf32, #tpu.memory_space<vmem>>, %arg5: memref<128x128xbf16, #tpu.memory_space<vmem>>, %arg6: memref<1x128xf32, #tpu.memory_space<vmem>>, %arg7: memref<128x128xbf16, #tpu.memory_space<vmem>>, %arg8: memref<1x128xf32, #tpu.memory_space<vmem>>, %arg9: memref<8x128xf32, #tpu.memory_space<vmem>>) attributes {dimension_semantics = [#tpu.dimension_semantics<parallel>], iteration_bounds = array<i64: 4>, scalar_prefetch = 1 : i64, scratch_operands = 0 : i64, tpu.core_type = #tpu.core_type<tc>, window_params = [{transform_indices = @transform_0, window_bounds = array<i64: 8, 128>}, {pipeline_mode = #tpu.pipeline_mode<synchronous>, transform_indices = @transform_1, window_bounds = array<i64: 128, 128>}, {pipeline_mode = #tpu.pipeline_mode<synchronous>, transform_indices = @transform_2, window_bounds = array<i64: 1, 128>}, {pipeline_mode = #tpu.pipeline_mode<synchronous>, transform_indices = @transform_3, window_bounds = array<i64: 128, 128>}, {pipeline_mode = #tpu.pipeline_mode<synchronous>, transform_indices = @transform_4, window_bounds = array<i64: 1, 128>}, {pipeline_mode = #tpu.pipeline_mode<synchronous>, transform_indices = @transform_5, window_bounds = array<i64: 128, 128>}, {pipeline_mode = #tpu.pipeline_mode<synchronous>, transform_indices = @transform_6, window_bounds = array<i64: 1, 128>}, {transform_indices = @transform_7, window_bounds = array<i64: 8, 128>}]} {
    %c0 = arith.constant 0 : index
    %c0_0 = arith.constant 0 : index
    %0 = vector.load %arg2[%c0, %c0_0] : memref<8x128xf32, #tpu.memory_space<vmem>>, vector<8x128xf32>
    %1 = arith.truncf %0 : vector<8x128xf32> to vector<8x128xbf16>
    %c0_1 = arith.constant 0 : index
    %c0_2 = arith.constant 0 : index
    %2 = vector.load %arg3[%c0_1, %c0_2] : memref<128x128xbf16, #tpu.memory_space<vmem>>, vector<128x128xbf16>
    %cst = arith.constant dense<0.000000e+00> : vector<8x128xf32>
    %3 = tpu.matmul %1, %2, %cst {dimension_numbers = #tpu.dot_dimension_numbers<[1], [0], [0], [1], [0, 0, 1, 1], [], []>} : vector<8x128xbf16>, vector<128x128xbf16>, vector<8x128xf32> -> vector<8x128xf32>
    %c0_3 = arith.constant 0 : index
    %c0_4 = arith.constant 0 : index
    %4 = vector.load %arg4[%c0_3, %c0_4] : memref<1x128xf32, #tpu.memory_space<vmem>>, vector<1x128xf32>
    %5 = vector.broadcast %4 : vector<1x128xf32> to vector<8x128xf32>
    %6 = arith.addf %3, %5 : vector<8x128xf32>
    %c0_5 = arith.constant 0 : index
    %7 = memref.load %arg1[%c0_5] : memref<2xf32, #tpu.memory_space<smem>>
    %cst_6 = arith.constant 0.000000e+00 : f32
    %8 = vector.broadcast %cst_6 : f32 to vector<8x128xf32>
    %9 = arith.cmpf oge, %6, %8 : vector<8x128xf32>
    %10 = vector.broadcast %7 : f32 to vector<8x128xf32>
    %11 = arith.mulf %10, %6 : vector<8x128xf32>
    %12 = arith.select %9, %6, %11 : vector<8x128xi1>, vector<8x128xf32>
    %13 = arith.truncf %12 : vector<8x128xf32> to vector<8x128xbf16>
    %c0_7 = arith.constant 0 : index
    %c0_8 = arith.constant 0 : index
    %14 = vector.load %arg5[%c0_7, %c0_8] : memref<128x128xbf16, #tpu.memory_space<vmem>>, vector<128x128xbf16>
    %cst_9 = arith.constant dense<0.000000e+00> : vector<8x128xf32>
    %15 = tpu.matmul %13, %14, %cst_9 {dimension_numbers = #tpu.dot_dimension_numbers<[1], [0], [0], [1], [0, 0, 1, 1], [], []>} : vector<8x128xbf16>, vector<128x128xbf16>, vector<8x128xf32> -> vector<8x128xf32>
    %c0_10 = arith.constant 0 : index
    %c0_11 = arith.constant 0 : index
    %16 = vector.load %arg6[%c0_10, %c0_11] : memref<1x128xf32, #tpu.memory_space<vmem>>, vector<1x128xf32>
    %17 = vector.broadcast %16 : vector<1x128xf32> to vector<8x128xf32>
    %18 = arith.addf %15, %17 : vector<8x128xf32>
    %c1 = arith.constant 1 : index
    %19 = memref.load %arg1[%c1] : memref<2xf32, #tpu.memory_space<smem>>
    %cst_12 = arith.constant 0.000000e+00 : f32
    %20 = vector.broadcast %cst_12 : f32 to vector<8x128xf32>
    %21 = arith.cmpf oge, %18, %20 : vector<8x128xf32>
    %22 = vector.broadcast %19 : f32 to vector<8x128xf32>
    %23 = arith.mulf %22, %18 : vector<8x128xf32>
    %24 = arith.select %21, %18, %23 : vector<8x128xi1>, vector<8x128xf32>
    %25 = arith.truncf %24 : vector<8x128xf32> to vector<8x128xbf16>
    %c0_13 = arith.constant 0 : index
    %c0_14 = arith.constant 0 : index
    %26 = vector.load %arg7[%c0_13, %c0_14] : memref<128x128xbf16, #tpu.memory_space<vmem>>, vector<128x128xbf16>
    %cst_15 = arith.constant dense<0.000000e+00> : vector<8x128xf32>
    %27 = tpu.matmul %25, %26, %cst_15 {dimension_numbers = #tpu.dot_dimension_numbers<[1], [0], [0], [1], [0, 0, 1, 1], [], []>} : vector<8x128xbf16>, vector<128x128xbf16>, vector<8x128xf32> -> vector<8x128xf32>
    %c0_16 = arith.constant 0 : index
    %c0_17 = arith.constant 0 : index
    %28 = vector.load %arg8[%c0_16, %c0_17] : memref<1x128xf32, #tpu.memory_space<vmem>>, vector<1x128xf32>
    %29 = vector.broadcast %28 : vector<1x128xf32> to vector<8x128xf32>
    %30 = arith.addf %27, %29 : vector<8x128xf32>
    %31 = arith.mulf %30, %30 : vector<8x128xf32>
    %cst_18 = arith.constant dense<0.000000e+00> : vector<8xf32>
    %32 = vector.multi_reduction <add>, %31, %cst_18 [1] : vector<8x128xf32> to vector<8xf32>
    %33 = vector.shape_cast %32 : vector<8xf32> to vector<8x1xf32>
    %cst_19 = arith.constant 1.000000e-24 : f32
    %34 = vector.broadcast %cst_19 : f32 to vector<8x1xf32>
    %35 = arith.maximumf %33, %34 : vector<8x1xf32>
    %36 = math.rsqrt %35 : vector<8x1xf32>
    %37 = vector.broadcast %36 : vector<8x1xf32> to vector<8x128xf32>
    %38 = arith.mulf %30, %37 : vector<8x128xf32>
    %c0_20 = arith.constant 0 : index
    %c0_21 = arith.constant 0 : index
    %39 = vector.load %arg9[%c0_20, %c0_21] : memref<8x128xf32, #tpu.memory_space<vmem>>, vector<8x128xf32>
    tpu.vector_store %arg9[%c0_20, %c0_21], %38 {strides = array<i32>} : memref<8x128xf32, #tpu.memory_space<vmem>>, vector<8x128xf32>,
    return
  }
  func.func @transform_0(%arg0: i32, %arg1: memref<2xf32, #tpu.memory_space<smem>>) -> (i32, i32) {
    %c0_i32 = arith.constant 0 : i32
    %c0_i32_0 = arith.constant 0 : i32
    return %arg0, %c0_i32 : i32, i32
  }
  func.func @transform_1(%arg0: i32, %arg1: memref<2xf32, #tpu.memory_space<smem>>) -> (i32, i32) {
    %c0_i32 = arith.constant 0 : i32
    %c0_i32_0 = arith.constant 0 : i32
    %c0_i32_1 = arith.constant 0 : i32
    return %c0_i32, %c0_i32_0 : i32, i32
  }
  func.func @transform_2(%arg0: i32, %arg1: memref<2xf32, #tpu.memory_space<smem>>) -> (i32, i32) {
    %c0_i32 = arith.constant 0 : i32
    %c0_i32_0 = arith.constant 0 : i32
    %c0_i32_1 = arith.constant 0 : i32
    return %c0_i32, %c0_i32_0 : i32, i32
  }
  func.func @transform_3(%arg0: i32, %arg1: memref<2xf32, #tpu.memory_space<smem>>) -> (i32, i32) {
    %c0_i32 = arith.constant 0 : i32
    %c0_i32_0 = arith.constant 0 : i32
    %c0_i32_1 = arith.constant 0 : i32
    return %c0_i32, %c0_i32_0 : i32, i32
  }
  func.func @transform_4(%arg0: i32, %arg1: memref<2xf32, #tpu.memory_space<smem>>) -> (i32, i32) {
    %c0_i32 = arith.constant 0 : i32
    %c0_i32_0 = arith.constant 0 : i32
    %c0_i32_1 = arith.constant 0 : i32
    return %c0_i32, %c0_i32_0 : i32, i32
  }
  func.func @transform_5(%arg0: i32, %arg1: memref<2xf32, #tpu.memory_space<smem>>) -> (i32, i32) {
    %c0_i32 = arith.constant 0 : i32
    %c0_i32_0 = arith.constant 0 : i32
    %c0_i32_1 = arith.constant 0 : i32
    return %c0_i32, %c0_i32_0 : i32, i32
  }
  func.func @transform_6(%arg0: i32, %arg1: memref<2xf32, #tpu.memory_space<smem>>) -> (i32, i32) {
    %c0_i32 = arith.constant 0 : i32
    %c0_i32_0 = arith.constant 0 : i32
    %c0_i32_1 = arith.constant 0 : i32
    return %c0_i32, %c0_i32_0 : i32, i32
  }
  func.func @transform_7(%arg0: i32, %arg1: memref<2xf32, #tpu.memory_space<smem>>) -> (i32, i32) {
    %c0_i32 = arith.constant 0 : i32
    %c0_i32_0 = arith.constant 0 : i32
    return %arg0, %c0_i32 : i32, i32
  }
}

</mosaic_0001>

<bundles_post_ra>
// kernel: mlp_encoder_forward.1
= control target key start
LH: loop header
LB: loop body
LE: loop exit
PB: predicated region body
PF: predicated region fallthrough
CT: control target
= control target key end

     0   :  { %s1233_s0 = inlined_call_operand.vmem [shape: f32[2], index: 0, kind: input, shape index: {}]   ;;  %s1234_s1 = inlined_call_operand.vmem [shape: f32[32,128], index: 1, kind: input, shape index: {}]   ;;  %s1235_s2 = inlined_call_operand.vmem [shape: bf16[128,128], index: 2, kind: input, shape index: {}]   ;;  %s1236_s3 = inlined_call_operand.vmem [shape: f32[1,128], index: 3, kind: input, shape index: {}]   ;;  %s1237_s4 = inlined_call_operand.hbm [shape: bf16[128,128], index: 4, kind: input, shape index: {}]   ;;  %s1238_s5 = inlined_call_operand.vmem [shape: f32[1,128], index: 5, kind: input, shape index: {}]   ;;  %s1239_s6 = inlined_call_operand.hbm [shape: bf16[128,128], index: 6, kind: input, shape index: {}]   ;;  %s1240_s7 = inlined_call_operand.vmem [shape: f32[1,128], index: 7, kind: input, shape index: {}]   ;;  %s1241_s8 = inlined_call_operand.vmem [shape: f32[32,128], index: 8, kind: output, shape index: {}]  }
   0x1   :  { %s13_s29 = sshll.u32 %s1233_s0, 4  ;;  %s14_s29 = int_to_ptr.vmem [resolvable:$true] %s13_s29 }
   0x2   :  { %s929_s30 = scalar_lea.vmem %s14_s29, 16  ;;  %p934_p1 = scmp.lt.s32.totalorder %s14_s29, %s14_s29 }
   0x3   :  { %p930_p0 = scmp.ne.s32.totalorder %s14_s29, %s929_s30  ;;  %p935_p2 = scmp.lt.s32.totalorder %s929_s30, %s929_s30 }
   0x5   :  { %p936_p3 = por %p935_p2, %p934_p1 }
   0x7   :  { %p937_p4 = pnand %p936_p3, %p930_p0 }
   0x9   :  { %940 = shalt.err (!%p937_p4)  }
   0xa   :  { %s1015_s9 = smov [#allocation3]  }
   0xb   :  { %16 = dma.vmem_to_smem %s14_s29, 16, %s1015_s9, [#allocation2] }
   0xc   :  { %1001 = dma.done.wait [#allocation2], 16 }
   0xd   :  { %1002 = vsyncadd [#allocation2], 4294967280 }
   0xe   :  { %18 = sfence }
   0xf   :  { %19 = vsyncpa [#allocation5], 0 }
  0x10   :  { %20 = vsyncpa [#allocation7], 0  ;;  %s1070_s10 = smov 0  }
  0x11 LB: > { %s1076_s0 = sadd.s32 4294967295, %s1013_s10   ;;  %p743_p5 = scmp.ge.s32.totalorder %s1013_s10, 1  ;;  %s1013_s10 = sphi %s1070_s10, %s26_s10  }
  0x12   : > { %p209_p6 = scmp.lt.s32.totalorder %s1013_s10, 5  ;;  %s1016_s11 = smov [#allocation4]  }
  0x13   : > { %s227_s12 = sshll.u32 %s1016_s11, 4  ;;  %p1242_p8 = scmp.eq.s32.totalorder %s1076_s0, 0  ;;  %s228_s12 = int_to_ptr.vmem [resolvable:$true] %s227_s12 }
  0x14   : > { %p1080_p7 = pnand %p743_p5, %p209_p6  ;;  %s1017_s14 = smov [#allocation6]  }
  0x15   : > { %s243_s15 = sshll.u32 %s1017_s14, 4  ;;  %s941_s19 = scalar_lea.hbm %s1237_s4, 1024  ;;  %s1093_s15 = int_to_ptr.vmem [resolvable:$true] %s243_s15 }
  0x16   : > { %s1244_s13 = scalar_select %p1080_p7, 1, 0 }
  0x17   : > { %p877_p9 = pneg %p1080_p7  ;;  %p942_p11 = scmp.ne.s32.totalorder %s1237_s4, %s941_s19 }
  0x18   : > { %p948_p1 = scmp.lt.u32.totalorder %s941_s19, %s1237_s4 }
  0x19   : > { %p1089_p10 = pnand %p1242_p8, %p877_p9 }
  0x1b   : > { %p943_p12 = pneg %p1089_p10 }
  0x1d   : > { %p944_p13 = pnand %p943_p12, %p942_p11 }
  0x1f   : > { %p945_p0 = pneg %p944_p13 }
  0x21   : > { %p950_p2 = pnand %p948_p1, %p945_p0 }
  0x23   : > { %953 = shalt.err (!%p950_p2)
}
  0x24   : > { %s954_s24 = scalar_lea.vmem %s228_s12, 1024  ;;  %p962_p6 = scmp.lt.s32.totalorder %s228_s12, %s228_s12 }
  0x25   : > { %p955_p3 = scmp.ne.s32.totalorder %s228_s12, %s954_s24  ;;  %p963_p9 = scmp.lt.s32.totalorder %s954_s24, %s954_s24 }
  0x27   : > { %p957_p4 = pnand %p955_p3, %p943_p12  ;;  %p964_p8 = por %p963_p9, %p962_p6 }
  0x29   : > { %p958_p5 = pneg %p957_p4 }
  0x2b   : > { %p965_p7 = pnand %p964_p8, %p958_p5 }
  0x2d   : > { %968 = shalt.err (!%p965_p7)
}
  0x2e   : > { %s1018_s25 = smov 64   ;;  %s1019_s26 = smov 4  }
  0x2f   : > { %880 = dma.hbm_to_vmem [thread:$0]  (!%p1089_p10), %s1237_s4, 1024, %s228_s12, [#allocation5], %s1018_s25, %s1018_s25, %s1019_s26  }
  0x30   : > { %s969_s9 = scalar_lea.hbm %s1239_s6, 1024 }
  0x31   : > { %p970_p11 = scmp.ne.s32.totalorder %s1239_s6, %s969_s9  ;;  %p976_p13 = scmp.lt.u32.totalorder %s969_s9, %s1239_s6 }
  0x33   : > { %p972_p7 = pnand %p970_p11, %p943_p12 }
  0x35   : > { %p973_p8 = pneg %p972_p7 }
  0x37   : > { %p978_p0 = pnand %p976_p13, %p973_p8 }
  0x39   : > { %981 = shalt.err (!%p978_p0)
}
  0x3a   : > { %s982_s12 = scalar_lea.vmem %s1093_s15, 1024  ;;  %p990_p4 = scmp.lt.s32.totalorder %s1093_s15, %s1093_s15 }
  0x3b   : > { %p983_p1 = scmp.ne.s32.totalorder %s1093_s15, %s982_s12  ;;  %p991_p5 = scmp.lt.s32.totalorder %s982_s12, %s982_s12 }
  0x3d   : > { %p985_p2 = pnand %p983_p1, %p943_p12  ;;  %p992_p6 = por %p991_p5, %p990_p4 }
  0x3f   : > { %p986_p3 = pneg %p985_p2 }
  0x41   : > { %p993_p9 = pnand %p992_p6, %p986_p3 }
  0x43   : > { %996 = shalt.err (!%p993_p9)
}
  0x44   : > { %883 = dma.hbm_to_vmem [thread:$0]  (!%p1089_p10), %s1239_s6, 1024, %s1093_s15, [#allocation7], %s1018_s25, %s1018_s25, %s1019_s26  }
  0x45   : > { %p1246_p11 = scmp.ne.s32.totalorder %s1244_s13, 0 }
  0x46   : > { %p1247_p7 = scmp.eq.s32.totalorder (!%p1246_p11), %s1076_s0, 0 }
  0x47   : > { %269 = sbr.rel (%p1246_p11) target bundleno = 928 (0x3a0), region = 48 }
  0x4e   : > { %1004 = dma.done.wait (%p1247_p7), [#allocation5], 1024   ;;  %p1248_p12 = pmov %p1247_p7 }
  0x4f   : > { %p1249_p8 = pmov %p1247_p7 }
  0x50   : > { %1006 = vsyncadd (%p1248_p12), [#allocation5], 4294966272 }
  0x51   : > { %1008 = dma.done.wait (%p1249_p8), [#allocation7], 1024   ;;  %p1250_p13 = pmov %p1247_p7 }
  0x52   : > { %v1020_v0 = vmov 0.0   ;;  %vm1021_vm0 = vmmov 0   ;;  %v903_v1 = vld [vmem:[%s1235_s2] sm:$0xff]   ;;  %v904_v2 = vld [vmem:[%s1235_s2 + $0x8] sm:$0xff]   ;;  %v905_v3 = vld [vmem:[%s1235_s2 + $0x10] sm:$0xff]   ;;  %p303_p10 = scmp.lt.s32.totalorder %s1076_s0, 3 }
  0x53   : > { %1010 = vsyncadd (%p1250_p13), [#allocation7], 4294966272  ;;  %809 = vmatprep.subr.bf16.mxu0 %v1020_v0  ;;  %825 = vmatprep.mubr.msk.bf16.mxu0 %vm1021_vm0, %v1020_v0  ;;  %v911_v4 = vld [vmem:[#allocation4] sm:$0xff]   ;;  %v906_v5 = vld [vmem:[%s1235_s2 + $0x18] sm:$0xff]   ;;  %s425_s20 = sld [smem:[#allocation3]]  ;;  %s770_s16 = sld [smem:[#allocation3 + $0x1]] }
  0x54   : > { %829 = vmatprep.subr.bf16.mxu1 %v1020_v0  ;;  %845 = vmatprep.mubr.msk.bf16.mxu1 %vm1021_vm0, %v1020_v0  ;;  %s1252_s0 = smov (!%p303_p10, %s1076_s0), 3  ;;  %v912_v6 = vld [vmem:[#allocation4 + $0x8] sm:$0xff]   ;;  %v907_v7 = vld [vmem:[%s1235_s2 + $0x20] sm:$0xff]   ;;  %v913_v8 = vld [vmem:[#allocation4 + $0x10] sm:$0xff]  }
  0x55   : > { %810 = vmatpush3.bf16.msra.mxu0 %v903_v1  ;;  %830 = vmatpush3.bf16.msra.mxu1 %v911_v4  ;;  %s750_s28 = sshll.u32 %s1252_s0, 3  ;;  %v908_v9 = vld [vmem:[%s1235_s2 + $0x28] sm:$0xff]   ;;  %v914_v10 = vld [vmem:[#allocation4 + $0x18] sm:$0xff]   ;;  %v909_v11 = vld [vmem:[%s1235_s2 + $0x30] sm:$0xff]  }
  0x56   : > { %811 = vmatprep.subr.bf16.mxu0 %v1020_v0  ;;  %831 = vmatprep.subr.bf16.mxu1 %v1020_v0  ;;  %s306_s18 = scalar_lea.vmem %s1234_s1, %s750_s28  ;;  %v915_v12 = vld [vmem:[#allocation4 + $0x20] sm:$0xff]   ;;  %v910_v13 = vld [vmem:[%s1235_s2 + $0x38] sm:$0xff]   ;;  %v916_v15 = vld [vmem:[#allocation4 + $0x28] sm:$0xff]   ;;  %s310_s27 = scalar_lea.vmem %s1241_s8, %s750_s28 }
  0x57   : > { %v312_v14 = vld [vmem:[%s306_s18] sm:$0xff]  ;;  %v917_v17 = vld [vmem:[#allocation4 + $0x30] sm:$0xff]   ;;  %v918_v18 = vld [vmem:[#allocation4 + $0x38] sm:$0xff]  }
  0x58   : > { %v313_v16 = vpack.c.bf16 %v312_v14, %v312_v14  ;;  %v919_v19 = vld [vmem:[#allocation6] sm:$0xff]   ;;  %v920_v20 = vld [vmem:[#allocation6 + $0x8] sm:$0xff]   ;;  %v921_v21 = vld [vmem:[#allocation6 + $0x10] sm:$0xff]  }
  0x59   : > { %812 = vmatpush3.bf16.msra.mxu0 %v904_v2  ;;  %832 = vmatpush3.bf16.msra.mxu1 %v912_v6  ;;  %v922_v22 = vld [vmem:[#allocation6 + $0x18] sm:$0xff]   ;;  %v923_v23 = vld [vmem:[#allocation6 + $0x20] sm:$0xff]   ;;  %v924_v24 = vld [vmem:[#allocation6 + $0x28] sm:$0xff]   ;;  %v427_v27 = vstv %s425_s20  ;;  %v544_v39 = vstv %s770_s16 }
  0x5a   : > { %813 = vmatprep.subr.bf16.mxu0 %v1020_v0  ;;  %833 = vmatprep.subr.bf16.mxu1 %v1020_v0  ;;  %v752_v25 = vld [vmem:[%s1236_s3] ss:$0 sm:$0xff]  ;;  %v925_v35 = vld [vmem:[#allocation6 + $0x30] sm:$0xff]   ;;  %v926_v36 = vld [vmem:[#allocation6 + $0x38] sm:$0xff]  }
  0x5b   : > { %v761_v37 = vld [vmem:[%s1238_s5] ss:$0 sm:$0xff] }
  0x5c   : > { %v771_v47 = vld [vmem:[%s1240_s7] ss:$0 sm:$0xff] }
  0x5d   : > { %814 = vmatpush3.bf16.msra.mxu0 %v905_v3  ;;  %834 = vmatpush3.bf16.msra.mxu1 %v913_v8 }
  0x5e   : > { %815 = vmatprep.subr.bf16.mxu0 %v1020_v0  ;;  %835 = vmatprep.subr.bf16.mxu1 %v1020_v0 }
  0x61   : > { %816 = vmatpush3.bf16.msra.mxu0 %v906_v5  ;;  %836 = vmatpush3.bf16.msra.mxu1 %v914_v10 }
  0x62   : > { %817 = vmatprep.subr.bf16.mxu0 %v1020_v0  ;;  %837 = vmatprep.subr.bf16.mxu1 %v1020_v0 }
  0x65   : > { %818 = vmatpush3.bf16.msra.mxu0 %v907_v7  ;;  %838 = vmatpush3.bf16.msra.mxu1 %v915_v12 }
  0x66   : > { %819 = vmatprep.subr.bf16.mxu0 %v1020_v0  ;;  %839 = vmatprep.subr.bf16.mxu1 %v1020_v0 }
  0x69   : > { %820 = vmatpush3.bf16.msra.mxu0 %v908_v9  ;;  %840 = vmatpush3.bf16.msra.mxu1 %v916_v15 }
  0x6a   : > { %821 = vmatprep.subr.bf16.mxu0 %v1020_v0  ;;  %841 = vmatprep.subr.bf16.mxu1 %v1020_v0 }
  0x6d   : > { %822 = vmatpush3.bf16.msra.mxu0 %v909_v11  ;;  %842 = vmatpush3.bf16.msra.mxu1 %v917_v17 }
  0x6e   : > { %823 = vmatprep.subr.bf16.mxu0 %v1020_v0  ;;  %843 = vmatprep.subr.bf16.mxu1 %v1020_v0 }
  0x71   : > { %824 = vmatpush3.bf16.msra.mxu0 %v910_v13  ;;  %844 = vmatpush3.bf16.msra.mxu1 %v918_v18 }
  0x72   : > { %849 = vmatprep.subr.bf16.mxu0 %v1020_v0 }
  0x74   : > { %826 = vmatmul.mubr.bf16.vlgmr.msra.gmra.mrb[0].mxu0 %v313_v16 }
  0x75   : > { %865 = vmatprep.mubr.msk.bf16.mxu0 %vm1021_vm0, %v1020_v0  ;;  %850 = vmatpush3.bf16.msra.mxu0 %v919_v19 }
  0x76   : > { %851 = vmatprep.subr.bf16.mxu0 %v1020_v0 }
  0x79   : > { %852 = vmatpush3.bf16.msra.mxu0 %v920_v20 }
  0x7a   : > { %853 = vmatprep.subr.bf16.mxu0 %v1020_v0 }
  0x7d   : > { %854 = vmatpush3.bf16.msra.mxu0 %v921_v21 }
  0x7e   : > { %855 = vmatprep.subr.bf16.mxu0 %v1020_v0 }
  0x81   : > { %856 = vmatpush3.bf16.msra.mxu0 %v922_v22 }
  0x82   : > { %857 = vmatprep.subr.bf16.mxu0 %v1020_v0 }
  0x85   : > { %858 = vmatpush3.bf16.msra.mxu0 %v923_v23 }
  0x86   : > { %859 = vmatprep.subr.bf16.mxu0 %v1020_v0 }
  0x89   : > { %860 = vmatpush3.bf16.msra.mxu0 %v924_v24 }
  0x8a   : > { %861 = vmatprep.subr.bf16.mxu0 %v1020_v0 }
  0x8d   : > { %862 = vmatpush3.bf16.msra.mxu0 %v925_v35 }
  0x8e   : > { %863 = vmatprep.subr.bf16.mxu0 %v1020_v0 }
  0x91   : > { %864 = vmatpush3.bf16.msra.mxu0 %v926_v36 }
 0x147   : > { %v419_v26 = vpop.f32.mrb[0].mxu0 }
 0x148   : > { %v420_v28 = vadd.f32 %v752_v25, %v419_v26  ;;  %v827_v29 = vpop.f32.mrb[1].mxu0 }
 0x149   : > { %v422_v30 = vpop.f32.mrb[2].mxu0 }
 0x14a   : > { %vm426_vm1 = vcmp.ge.f32.partialorder %v420_v28, 0.0  ;;  %v428_v31 = vmul.f32 %v427_v27, %v420_v28  ;;  %v828_v32 = vpop.f32.mrb[3].mxu0 }
 0x14c   : > { %v429_v33 = vsel %vm426_vm1, %v420_v28, %v428_v31 }
 0x14d   : > { %v430_v34 = vpack.c.bf16 %v429_v33, %v429_v33 }
 0x14f   : > { %846 = vmatmul.mubr.bf16.vlgmr.msra.gmra.mrb[0].mxu1 %v430_v34 }
 0x222   : > { %v536_v38 = vpop.f32.mrb[0].mxu1 }
 0x223   : > { %v537_v40 = vadd.f32 %v761_v37, %v536_v38  ;;  %v847_v41 = vpop.f32.mrb[1].mxu1 }
 0x224   : > { %v539_v42 = vpop.f32.mrb[2].mxu1 }
 0x225   : > { %vm543_vm2 = vcmp.ge.f32.partialorder %v537_v40, 0.0  ;;  %v545_v43 = vmul.f32 %v544_v39, %v537_v40  ;;  %v848_v44 = vpop.f32.mrb[3].mxu1 }
 0x227   : > { %v546_v45 = vsel %vm543_vm2, %v537_v40, %v545_v43 }
 0x228   : > { %v547_v46 = vpack.c.bf16 %v546_v45, %v546_v45 }
 0x22a   : > { %866 = vmatmul.mubr.bf16.vlgmr.msra.gmra.mrb[4].mxu0 %v547_v46 }
 0x2fd   : > { %v653_v48 = vpop.f32.mrb[4].mxu0 }
 0x2fe   : > { %v654_v49 = vadd.f32 %v771_v47, %v653_v48  ;;  %v867_v50 = vpop.f32.mrb[5].mxu0 }
 0x2ff   : > { %v656_v51 = vpop.f32.mrb[6].mxu0 }
 0x300   : > { %v868_v52 = vpop.f32.mrb[7].mxu0  ;;  %v659_v53 = vmul.f32 %v654_v49, %v654_v49 }
 0x302   : > { %660 = vadd.xlane.f32.xlu0 %v659_v53 }
 0x38f   : > { %v661_v54 = vpop.xlane.xlu0 %660 }
 0x390   : > { %v662_v55 = vmax.f32 %v661_v54, 1e-24 }
 0x392   : > { %927 = vrsqrt.f32 %v662_v55 }
 0x39c   : > { %v928_v56 = vpop.eup %927 }
 0x39d   : > { %v664_v57 = vmul.f32 %v928_v56, %v654_v49 }
 0x39f   : > { %665 = vst [vmem:[%s310_s27] sm:$0xff] %v664_v57 }
 0x3a0 PF: > { %s26_s10 = sadd.s32 1, %s1013_s10  }
 0x3a1   : > { %p23_p0 = scmp.ge.s32.totalorder %s26_s10, 6  }
 0x3a3   :  { %25 = sbr.rel (!%p23_p0) target bundleno = 17 (0x11), region = 87 }
 0x3aa   :  { %685 = vsyncpa [#allocation5], 1 }
 0x3ab   :  { %687 = vsyncpa [#allocation5 + $0x1], 1 }
 0x3ac   :  { %688 = vsyncpa [#allocation7], 1 }

</bundles_post_ra>
